<compile_context>
chip_gen: v5e
topology: v5e:2x2
jax: 0.10.0
libtpu: 0.0.40
codegen_flags: <defaults>
</compile_context>

<pallas_src>
import functools

import jax
import jax.numpy as jnp
import numpy as np
from jax.experimental import pallas as pl
from jax.experimental.pallas import tpu as pltpu


def _pick_tm(hw):
    """Position-tile (lane) size.

    Prefer big tiles (amortize ~0.35us/step pipeline overhead); padding up to
    the chosen tile is allowed.  Cost = padded positions (HBM bytes proxy)
    plus ~512 position-equivalents of per-step overhead.
    """
    best_tm, best_cost = 128, None
    for tm in (4096, 2048, 1024, 512, 256, 128):
        n = -(-hw // tm)                      # ceil(hw / tm)
        cost = n * tm + 512 * n
        if best_cost is None or cost < best_cost:
            best_tm, best_cost = tm, cost
    return best_tm


# ---------------------------------------------------------------------------
# Pallas kernel: one detection layer, one (batch, position-tile) grid step.
#   raw       = W' @ x + b''                    (ImplicitA/ImplicitM pre-folded)
#   sig       = 1 / (1 + exp(-raw))             (divide on the EUP)
#   grid_term = [gxs gys delta] @ [gx; gy; 1]   (on the idle MXU)
#   y         = sig * (alpha*sig + beta) + grid_term
#     alpha = 4*mwh*anchor, beta = 2*stride*mxy + (1-mxy-mwh),
#     gxs/gys = stride on the x/y channels, delta = -0.5*stride*mxy
# ---------------------------------------------------------------------------
def detect_kernel(need_raw, x_ref, w_ref, c_ref, gc_ref, g_ref, *out_refs):
    if need_raw:
        raw_ref, y_ref = out_refs
    else:
        (y_ref,) = out_refs

    w = w_ref[...]                           # (Cout, Cin)  f32 or bf16
    x = x_ref[0]                             # (Cin, tm)    f32 (HBM stays f32)
    if x.dtype != w.dtype:
        x = x.astype(w.dtype)                # in-kernel cast: no extra HBM pass
    c = c_ref[...]                           # (Cout, 3) f32: [bias'', alpha, beta]

    out = jnp.dot(w, x, preferred_element_type=jnp.float32) + c[:, 0:1]

    if need_raw:
        raw_ref[0] = out.astype(raw_ref.dtype)

    # sigmoid with the divide on the EUP (approx reciprocal, ~1e-3-level dev).
    sig = pl.reciprocal(1.0 + jnp.exp(-out), approx=True)

    # grid/anchor offset on the otherwise-idle MXU: (Cout,3) @ (3,tm)
    grid_term = jnp.dot(gc_ref[...], g_ref[...], preferred_element_type=jnp.float32)

    # factored decode polynomial: one fewer VALU mul per element.
    y_ref[0] = (sig * (c[:, 1:2] * sig + c[:, 2:3]) + grid_term).astype(y_ref.dtype)


def run_detect_layer(x_p, w_fold, consts_sb, consts_g, grid_tbl, *, tm,
                     need_raw=True, raw_dtype=jnp.float32, out_dtype=jnp.float32):
    """x_p: (bs, Cin, HW_pad) f32;  w_fold: (Cout, Cin);
    consts_sb/consts_g: (Cout, 3) f32;  grid_tbl: (3, HW_pad) f32."""
    bs, cin, hwp = x_p.shape
    cout = w_fold.shape[0]
    assert hwp % tm == 0
    n_tiles = hwp // tm

    in_specs = [
        pl.BlockSpec((1, cin, tm), lambda b, j: (b, 0, j)),   # activations
        pl.BlockSpec((cout, cin), lambda b, j: (0, 0)),       # folded weights
        pl.BlockSpec((cout, 3), lambda b, j: (0, 0)),         # [bias'', alpha, beta]
        pl.BlockSpec((cout, 3), lambda b, j: (0, 0)),         # [gxs, gys, delta]
        pl.BlockSpec((3, tm), lambda b, j: (0, j)),           # [gx; gy; 1] table
    ]
    # NOTE: if profiling ever shows exposed activation-DMA waits, add
    # pipeline_mode=pl.Buffered(3) to in_specs[0] (cheap VMEM, a few % win).
    out_block = pl.BlockSpec((1, cout, tm), lambda b, j: (b, 0, j))

    out_shapes, out_specs = [], []
    if need_raw:
        out_shapes.append(jax.ShapeDtypeStruct((bs, cout, hwp), raw_dtype))
        out_specs.append(out_block)
    out_shapes.append(jax.ShapeDtypeStruct((bs, cout, hwp), out_dtype))
    out_specs.append(out_block)

    outs = pl.pallas_call(
        functools.partial(detect_kernel, need_raw),
        out_shape=tuple(out_shapes),
        grid_spec=pltpu.PrefetchScalarGridSpec(
            num_scalar_prefetch=0,
            grid=(bs, n_tiles),
            in_specs=in_specs,
            out_specs=out_specs),
        compiler_params=pltpu.CompilerParams(
            dimension_semantics=("parallel", "parallel")),
    )(x_p, w_fold, consts_sb, consts_g, grid_tbl)

    if need_raw:
        return outs[0], outs[1]
    return None, outs[0]


# ---------------------------------------------------------------------------
# Glue: Detect module parameters + forward (inference mode)
# ---------------------------------------------------------------------------
def make_grid(nx, ny):
    yv, xv = jnp.meshgrid(jnp.arange(ny), jnp.arange(nx), indexing="ij")
    return jnp.stack((xv, yv), 2).reshape(1, 1, ny, nx, 2).astype(jnp.float32)


class DetectPallas:
    def __init__(self, key, nc, ch, anchors, strides, use_bf16=False,
                 out_dtype=jnp.float32, raw_dtype=jnp.float32):
        self.nc = nc
        self.no = nc + 5
        self.nl = len(anchors)
        self.na = len(anchors[0]) // 2
        self.stride = [float(s) for s in strides]
        self.out_dtype = out_dtype
        self.raw_dtype = raw_dtype
        self.anchors = jnp.asarray(anchors, jnp.float32).reshape(self.nl, -1, 2)
        # anchor_grid broadcasts over (bs, na, ny, nx, 2) (reference path)
        self.anchor_grid = self.anchors.reshape(self.nl, 1, -1, 1, 1, 2)
        self._grid_cache = {}   # (ny, nx, hw_pad) -> (3, hw_pad) [gx; gy; 1]

        cout = self.no * self.na
        # raw (PyTorch-equivalent) parameters
        self.w, self.b, self.ia, self.im = [], [], [], []
        for cin in ch:
            k1, k2, k3, k4, key = jax.random.split(key, 5)
            self.w.append(jax.random.normal(k1, (cout, cin), jnp.float32) * 0.02)
            self.b.append(jax.random.normal(k2, (cout,), jnp.float32) * 0.02)
            self.ia.append(jax.random.normal(k3, (cin,), jnp.float32) * 0.02)      # ImplicitA
            self.im.append(1.0 + jax.random.normal(k4, (cout,), jnp.float32) * 0.02)  # ImplicitM

        # --- fold ImplicitA/ImplicitM into W/b and precompute decode constants ---
        mat_dtype = jnp.bfloat16 if use_bf16 else jnp.float32
        o_idx = np.arange(cout) % self.no
        a_idx = np.arange(cout) // self.no
        mxy = (o_idx < 2).astype(np.float32)
        mwh = ((o_idx >= 2) & (o_idx < 4)).astype(np.float32)

        self.w_fold, self.consts_sb, self.consts_g = [], [], []
        for i, cin in enumerate(ch):
            w = np.asarray(self.w[i])
            b = np.asarray(self.b[i])
            ia = np.asarray(self.ia[i])
            im = np.asarray(self.im[i])
            w_f = w * im[:, None]                               # (Cout, Cin)
            b_f = (w @ ia + b) * im                             # (Cout,)

            s = self.stride[i]
            anc = np.asarray(self.anchors[i])                   # (na, 2)
            anc_ch = np.where(o_idx == 2, anc[a_idx, 0],
                     np.where(o_idx == 3, anc[a_idx, 1], 0.0)).astype(np.float32)
            alpha = 4.0 * mwh * anc_ch
            beta = 2.0 * s * mxy + (1.0 - mxy - mwh)
            gxs = np.where(o_idx == 0, s, 0.0).astype(np.float32)
            gys = np.where(o_idx == 1, s, 0.0).astype(np.float32)
            delta = -0.5 * s * mxy

            self.w_fold.append(jnp.asarray(w_f, mat_dtype))
            self.consts_sb.append(
                jnp.asarray(np.stack([b_f, alpha, beta], axis=1), jnp.float32))
            self.consts_g.append(
                jnp.asarray(np.stack([gxs, gys, delta], axis=1), jnp.float32))

    def _grid_table(self, ny, nx, hwp):
        key = (ny, nx, hwp)
        tbl = self._grid_cache.get(key)
        if tbl is None:
            hw = ny * nx
            gyv, gxv = np.meshgrid(np.arange(ny), np.arange(nx), indexing="ij")
            g = np.zeros((3, hwp), np.float32)
            g[0, :hw] = gxv.reshape(-1)
            g[1, :hw] = gyv.reshape(-1)
            g[2, :] = 1.0
            tbl = jnp.asarray(g)
            self._grid_cache[key] = tbl
        return tbl

    def forward(self, xs, need_raw=True):
        """xs: list of NCHW float32 arrays. Returns (z, x_list) as in eval mode."""
        z, x_out = [], []
        for i in range(self.nl):
            x = xs[i]
            bs, cin, ny, nx = x.shape
            hw = ny * nx
            tm = _pick_tm(hw)
            # keep >= 2 grid steps so both TensorCores (v7x) get work
            if bs == 1:
                while tm > 128 and -(-hw // tm) < 2:
                    tm //= 2
            hwp = -(-hw // tm) * tm

            # NCHW -> (bs, Cin, HW): pure reshape, no transpose / extra HBM pass.
            # Activations stay f32 in HBM; any bf16 cast happens inside the kernel.
            x_p = x.reshape(bs, cin, hw)
            if hwp != hw:
                x_p = jnp.pad(x_p, ((0, 0), (0, 0), (0, hwp - hw)))

            g3 = self._grid_table(ny, nx, hwp)

            raw, y = run_detect_layer(
                x_p, self.w_fold[i], self.consts_sb[i], self.consts_g[i], g3,
                tm=tm, need_raw=need_raw,
                raw_dtype=self.raw_dtype, out_dtype=self.out_dtype)

            # (bs, Cout, HW) -> (bs, na, ny, nx, no)   (channel c = a*no + o)
            def to5d(t):
                return jnp.transpose(
                    t[:, :, :hw].reshape(bs, self.na, self.no, ny, nx),
                    (0, 1, 3, 4, 2))

            # TODO(synk): for a fully fused head, let downstream consume the
            # kernel-native (bs, Cout, HW) layout (or write y straight into a
            # preallocated z slab) and drop this transpose/concat HBM pass.
            if need_raw:
                x_out.append(to5d(raw))
            z.append(to5d(y).reshape(bs, -1, self.no))
        return jnp.concatenate(z, axis=1), x_out

    # pure-JAX reference of the PyTorch forward (eval mode), uses unfolded params
    def forward_ref(self, xs):
        z, x_out = [], []
        for i in range(self.nl):
            x = xs[i]
            bs, cin, ny, nx = x.shape
            xin = x + self.ia[i].reshape(1, cin, 1, 1)
            out = jnp.einsum("bchw,oc->bohw", xin, self.w[i],
                             preferred_element_type=jnp.float32)
            out = out + self.b[i].reshape(1, -1, 1, 1)
            out = out * self.im[i].reshape(1, -1, 1, 1)
            xr = jnp.transpose(out.reshape(bs, self.na, self.no, ny, nx),
                               (0, 1, 3, 4, 2))
            y = jax.nn.sigmoid(xr)
            g = make_grid(nx, ny)
            y = y.at[..., 0:2].set((y[..., 0:2] * 2.0 - 0.5 + g) * self.stride[i])
            y = y.at[..., 2:4].set((y[..., 2:4] * 2.0) ** 2 * self.anchor_grid[i])
            x_out.append(xr)
            z.append(y.reshape(bs, -1, self.no))
        return jnp.concatenate(z, axis=1), x_out


if __name__ == "__main__":
    key = jax.random.PRNGKey(0)

    nc = 15                                   # -> no = 20
    ch = (16, 32)                             # input channels per level
    anchors = ((10, 13, 16, 30, 33, 23),
               (30, 61, 62, 45, 59, 119))     # nl = 2, na = 3
    strides = (8.0, 16.0)
    bs = 2
    spatial = ((16, 16), (8, 8))

    kp, key = jax.random.split(key)
    det = DetectPallas(kp, nc, ch, anchors, strides)

    xs = []
    for (cin, (ny, nx)) in zip(ch, spatial):
        key, k = jax.random.split(key)
        xs.append(jax.random.normal(k, (bs, cin, ny, nx), jnp.float32))

    # ---- full-precision path (semantics-exact vs reference) ----
    z, x_list = det.forward(xs)
    jax.block_until_ready(z)
    for t in x_list:
        jax.block_until_ready(t)

    z_ref, x_ref = det.forward_ref(xs)
    np.testing.assert_allclose(np.asarray(z), np.asarray(z_ref),
                               rtol=1e-2, atol=2e-2)
    for a, b in zip(x_list, x_ref):
        np.testing.assert_allclose(np.asarray(a), np.asarray(b),
                                   rtol=1e-2, atol=1e-2)

    # ---- lean inference path: bf16 weights, bf16 decoded output, raw skipped ----
    det_lean = DetectPallas(kp, nc, ch, anchors, strides,
                            use_bf16=True, out_dtype=jnp.bfloat16)
    z16, x16 = det_lean.forward(xs, need_raw=False)
    jax.block_until_ready(z16)
    assert len(x16) == 0
    np.testing.assert_allclose(np.asarray(z16.astype(jnp.float32)),
                               np.asarray(z_ref), rtol=5e-2, atol=0.1)

    print("KERNEL_OK")
</pallas_src>

<mosaic_0001>
module attributes {stable_mosaic.version = 11 : i64} {
  func.func @detect_kernel(%arg0: i32, %arg1: i32, %arg2: memref<1x16x256xf32, #tpu.memory_space<vmem>>, %arg3: memref<60x16xf32, #tpu.memory_space<vmem>>, %arg4: memref<60x3xf32, #tpu.memory_space<vmem>>, %arg5: memref<60x3xf32, #tpu.memory_space<vmem>>, %arg6: memref<3x256xf32, #tpu.memory_space<vmem>>, %arg7: memref<1x60x256xf32, #tpu.memory_space<vmem>>, %arg8: memref<1x60x256xf32, #tpu.memory_space<vmem>>) attributes {dimension_semantics = [#tpu.dimension_semantics<parallel>, #tpu.dimension_semantics<parallel>], iteration_bounds = array<i64: 2, 1>, scalar_prefetch = 0 : i64, scratch_operands = 0 : i64, tpu.core_type = #tpu.core_type<tc>, window_params = [{transform_indices = @transform_0, window_bounds = array<i64: 1, 16, 256>}, {pipeline_mode = #tpu.pipeline_mode<synchronous>, transform_indices = @transform_1, window_bounds = array<i64: 60, 16>}, {pipeline_mode = #tpu.pipeline_mode<synchronous>, transform_indices = @transform_2, window_bounds = array<i64: 60, 3>}, {pipeline_mode = #tpu.pipeline_mode<synchronous>, transform_indices = @transform_3, window_bounds = array<i64: 60, 3>}, {transform_indices = @transform_4, window_bounds = array<i64: 3, 256>}, {transform_indices = @transform_5, window_bounds = array<i64: 1, 60, 256>}, {transform_indices = @transform_6, window_bounds = array<i64: 1, 60, 256>}]} {
    %c0 = arith.constant 0 : index
    %c0_0 = arith.constant 0 : index
    %0 = vector.load %arg3[%c0, %c0_0] : memref<60x16xf32, #tpu.memory_space<vmem>>, vector<60x16xf32>
    %c0_1 = arith.constant 0 : index
    %c0_2 = arith.constant 0 : index
    %c0_3 = arith.constant 0 : index
    %1 = vector.load %arg2[%c0_1, %c0_2, %c0_3] : memref<1x16x256xf32, #tpu.memory_space<vmem>>, vector<1x16x256xf32>
    %2 = vector.shape_cast %1 : vector<1x16x256xf32> to vector<16x256xf32>
    %c0_4 = arith.constant 0 : index
    %c0_5 = arith.constant 0 : index
    %3 = vector.load %arg4[%c0_4, %c0_5] : memref<60x3xf32, #tpu.memory_space<vmem>>, vector<60x3xf32>
    %cst = arith.constant dense<0.000000e+00> : vector<60x256xf32>
    %4 = tpu.matmul %0, %2, %cst {dimension_numbers = #tpu.dot_dimension_numbers<[1], [0], [0], [1], [0, 0, 1, 1], [], []>} : vector<60x16xf32>, vector<16x256xf32>, vector<60x256xf32> -> vector<60x256xf32>
    %5 = vector.extract_strided_slice %3 {offsets = [0, 0], sizes = [60, 1], strides = [1, 1]} : vector<60x3xf32> to vector<60x1xf32>
    %6 = vector.broadcast %5 : vector<60x1xf32> to vector<60x256xf32>
    %7 = arith.addf %4, %6 : vector<60x256xf32>
    %c0_6 = arith.constant 0 : index
    %c0_7 = arith.constant 0 : index
    %c0_8 = arith.constant 0 : index
    %8 = vector.load %arg7[%c0_6, %c0_7, %c0_8] : memref<1x60x256xf32, #tpu.memory_space<vmem>>, vector<1x60x256xf32>
    %9 = vector.shape_cast %8 : vector<1x60x256xf32> to vector<60x256xf32>
    %10 = vector.shape_cast %7 : vector<60x256xf32> to vector<1x60x256xf32>
    tpu.vector_store %arg7[%c0_6, %c0_7, %c0_8], %10 {strides = array<i32>} : memref<1x60x256xf32, #tpu.memory_space<vmem>>, vector<1x60x256xf32>,
    %cst_9 = arith.constant 0.000000e+00 : f32
    %11 = vector.broadcast %cst_9 : f32 to vector<60x256xf32>
    %12 = arith.subf %11, %7 : vector<60x256xf32>
    %13 = math.exp %12 : vector<60x256xf32>
    %cst_10 = arith.constant 1.000000e+00 : f32
    %14 = vector.broadcast %cst_10 : f32 to vector<60x256xf32>
    %15 = arith.addf %14, %13 : vector<60x256xf32>
    %16 = tpu.reciprocal %15 {approx = true} : vector<60x256xf32> -> vector<60x256xf32>
    %c0_11 = arith.constant 0 : index
    %c0_12 = arith.constant 0 : index
    %17 = vector.load %arg5[%c0_11, %c0_12] : memref<60x3xf32, #tpu.memory_space<vmem>>, vector<60x3xf32>
    %c0_13 = arith.constant 0 : index
    %c0_14 = arith.constant 0 : index
    %18 = vector.load %arg6[%c0_13, %c0_14] : memref<3x256xf32, #tpu.memory_space<vmem>>, vector<3x256xf32>
    %cst_15 = arith.constant dense<0.000000e+00> : vector<60x256xf32>
    %19 = tpu.matmul %17, %18, %cst_15 {dimension_numbers = #tpu.dot_dimension_numbers<[1], [0], [0], [1], [0, 0, 1, 1], [], []>} : vector<60x3xf32>, vector<3x256xf32>, vector<60x256xf32> -> vector<60x256xf32>
    %20 = vector.extract_strided_slice %3 {offsets = [0, 1], sizes = [60, 1], strides = [1, 1]} : vector<60x3xf32> to vector<60x1xf32>
    %21 = vector.broadcast %20 : vector<60x1xf32> to vector<60x256xf32>
    %22 = arith.mulf %21, %16 : vector<60x256xf32>
    %23 = vector.extract_strided_slice %3 {offsets = [0, 2], sizes = [60, 1], strides = [1, 1]} : vector<60x3xf32> to vector<60x1xf32>
    %24 = vector.broadcast %23 : vector<60x1xf32> to vector<60x256xf32>
    %25 = arith.addf %22, %24 : vector<60x256xf32>
    %26 = arith.mulf %16, %25 : vector<60x256xf32>
    %27 = arith.addf %26, %19 : vector<60x256xf32>
    %c0_16 = arith.constant 0 : index
    %c0_17 = arith.constant 0 : index
    %c0_18 = arith.constant 0 : index
    %28 = vector.load %arg8[%c0_16, %c0_17, %c0_18] : memref<1x60x256xf32, #tpu.memory_space<vmem>>, vector<1x60x256xf32>
    %29 = vector.shape_cast %28 : vector<1x60x256xf32> to vector<60x256xf32>
    %30 = vector.shape_cast %27 : vector<60x256xf32> to vector<1x60x256xf32>
    tpu.vector_store %arg8[%c0_16, %c0_17, %c0_18], %30 {strides = array<i32>} : memref<1x60x256xf32, #tpu.memory_space<vmem>>, vector<1x60x256xf32>,
    return
  }
  func.func @transform_0(%arg0: i32, %arg1: i32) -> (i32, i32, i32) {
    %c0_i32 = arith.constant 0 : i32
    %c0_i32_0 = arith.constant 0 : i32
    return %arg0, %c0_i32, %arg1 : i32, i32, i32
  }
  func.func @transform_1(%arg0: i32, %arg1: i32) -> (i32, i32) {
    %c0_i32 = arith.constant 0 : i32
    %c0_i32_0 = arith.constant 0 : i32
    %c0_i32_1 = arith.constant 0 : i32
    return %c0_i32, %c0_i32_0 : i32, i32
  }
  func.func @transform_2(%arg0: i32, %arg1: i32) -> (i32, i32) {
    %c0_i32 = arith.constant 0 : i32
    %c0_i32_0 = arith.constant 0 : i32
    %c0_i32_1 = arith.constant 0 : i32
    return %c0_i32, %c0_i32_0 : i32, i32
  }
  func.func @transform_3(%arg0: i32, %arg1: i32) -> (i32, i32) {
    %c0_i32 = arith.constant 0 : i32
    %c0_i32_0 = arith.constant 0 : i32
    %c0_i32_1 = arith.constant 0 : i32
    return %c0_i32, %c0_i32_0 : i32, i32
  }
  func.func @transform_4(%arg0: i32, %arg1: i32) -> (i32, i32) {
    %c0_i32 = arith.constant 0 : i32
    %c0_i32_0 = arith.constant 0 : i32
    return %c0_i32, %arg1 : i32, i32
  }
  func.func @transform_5(%arg0: i32, %arg1: i32) -> (i32, i32, i32) {
    %c0_i32 = arith.constant 0 : i32
    %c0_i32_0 = arith.constant 0 : i32
    return %arg0, %c0_i32, %arg1 : i32, i32, i32
  }
  func.func @transform_6(%arg0: i32, %arg1: i32) -> (i32, i32, i32) {
    %c0_i32 = arith.constant 0 : i32
    %c0_i32_0 = arith.constant 0 : i32
    return %arg0, %c0_i32, %arg1 : i32, i32, i32
  }
}

</mosaic_0001>

<bundles_post_ra>
// kernel: tpu_custom_call.1
= control target key start
LH: loop header
LB: loop body
LE: loop exit
PB: predicated region body
PF: predicated region fallthrough
CT: control target
= control target key end

     0   :  { %s1234_s21 = smov 0   ;;  %s1236_s22 = smov 0   ;;  %s1509_s0 = inlined_call_operand.vmem [shape: f32[2,16,256], index: 0, kind: input, shape index: {}]   ;;  %s1510_s1 = inlined_call_operand.vmem [shape: f32[60,16], index: 1, kind: input, shape index: {}]   ;;  %s1511_s2 = inlined_call_operand.vmem [shape: f32[60,3], index: 2, kind: input, shape index: {}]   ;;  %s1512_s3 = inlined_call_operand.vmem [shape: f32[60,3], index: 3, kind: input, shape index: {}]   ;;  %s1513_s4 = inlined_call_operand.vmem [shape: f32[3,256], index: 4, kind: input, shape index: {}]   ;;  %s1514_s5 = inlined_call_operand.vmem [shape: f32[2,60,256], index: 5, kind: output, shape index: {0}]   ;;  %s1515_s6 = inlined_call_operand.vmem [shape: f32[2,60,256], index: 6, kind: output, shape index: {1}]  }
   0x1   :  { %s1238_s23 = smov 0  }
   0x2 LB: > { %s29_s24 = sadd.s32 1, %s1190_s22  ;;  %p1026_p0 = scmp.ge.s32.totalorder %s1194_s23, 1  ;;  %s1194_s23 = sphi %s1238_s23, %s17_s23   ;;  %s1190_s22 = sphi %s1236_s22, %s1517_s22   ;;  %s1186_s21 = sphi %s1234_s21, %s1516_s21  }
   0x3   : > { %p31_p1 = scmp.ge.s32.totalorder %s29_s24, 2  ;;  %p249_p2 = scmp.lt.s32.totalorder %s1194_s23, 3 }
   0x5   : > { %s1519_s24 = smov (%p31_p1, %s29_s24), 0  ;;  %p250_p3 = pnand %p1026_p0, %p249_p2 }
   0x6   : > { %p302_p4 = scmp.lt.s32.totalorder (!%p250_p3), %s1186_s21, 1 }
   0x7   : > { %253 = sbr.rel (%p250_p3) target bundleno = 235 (0xeb), region = 40 }
   0xc   : > { %v1255_v0 = vld [vmem:[%s1511_s2 + $0x10] sm:$0xff]  ;;  %v1260_v1 = vld [vmem:[%s1511_s2] sm:$0xff]  ;;  %v1196_v2 = vmov 0   ;;  %s1521_s21 = smov (!%p302_p4, %s1186_s21), 1  ;;  %vm397_vm0 = vcmask 130048   ;;  %v1285_v10 = vld [vmem:[%s1511_s2 + $0x18] sm:$0xff] }
   0xd   : > { %1100 = vset.pattern.permute.xlu1 %v1196_v2  ;;  %1099 = vset.pattern.permute.xlu0 %v1196_v2  ;;  %v1269_v3 = vld [vmem:[%s1511_s2 + $0x20] sm:$0xff]  ;;  %s1069_s9 = sshll.u32 %s1521_s21, 5  ;;  %v350_v11 = vld [vmem:[%s1511_s2 + $0x8] sm:$0xff]  ;;  %vm638_vm1 = vcmask 1042432   ;;  %vm613_vm2 = vcmask 23552   ;;  %v355_v18 = vld [vmem:[%s1511_s2 + $0x30] sm:$0xff] }
   0xe   : > { %369 = vperm.xlu1 %1100, %v1255_v0   ;;  %359 = vperm.xlu0 %1099, %v1260_v1   ;;  %v608_v4 = vld [vmem:[%s1513_s4] sm:$0x77]  ;;  %s309_s12 = scalar_lea.vmem %s1509_s0, %s1069_s9  ;;  %v1298_v13 = vld [vmem:[%s1511_s2 + $0x28] sm:$0xff]  ;;  %v1310_v17 = vld [vmem:[%s1511_s2 + $0x38] sm:$0xf]  ;;  %v1197_v20 = vmov 1  }
   0xf   : > { %1101 = vset.pattern.permute.xlu2 %v1196_v2  ;;  %610 = vst [vmem:[#allocation1] ss:$2 sm:$0xff] %v608_v4  ;;  %v347_v5 = vld [vmem:[%s309_s12 + $0x10] sm:$0xff]  ;;  %v348_v6 = vld [vmem:[%s309_s12 + $0x18] sm:$0xff]  ;;  %v345_v7 = vld [vmem:[%s309_s12] sm:$0xff]  ;;  %v1198_v27 = vmov 2  }
  0x10   : > { %379 = vperm.xlu2 %1101, %v1269_v3   ;;  %436 = vmatpush.msra.mxu0 %v347_v5  ;;  %v346_v8 = vld [vmem:[%s309_s12 + $0x8] sm:$0xff]  ;;  %v337_v9 = vld [vmem:[%s1510_s1] sm:$0xff]  ;;  %v339_v21 = vld [vmem:[%s1510_s1 + $0x10] sm:$0xff]  ;;  %s1070_s15 = sshll.u32 %s1521_s21, 7 }
  0x11   : > { %477 = vmatpush.msra.mxu1 %v348_v6  ;;  %v600_v12 = vld [vmem:[%s1512_s3] sm:$0xff]  ;;  %v338_v16 = vld [vmem:[%s1510_s1 + $0x8] sm:$0xff]  ;;  %v602_v22 = vld [vmem:[%s1512_s3 + $0x10] sm:$0xff]  ;;  %s1413_s18 = scalar_lea.vmem %s1514_s5, %s1070_s15  ;;  %s1448_s25 = scalar_lea.vmem %s1515_s6, %s1070_s15 }
  0x12   : > { %437 = vmatpush.msra.mxu0 %v345_v7  ;;  %v601_v19 = vld [vmem:[%s1512_s3 + $0x8] sm:$0xff]  ;;  %v340_v23 = vld [vmem:[%s1510_s1 + $0x18] sm:$0xff]  ;;  %v341_v25 = vld [vmem:[%s1510_s1 + $0x20] sm:$0xff] }
  0x13   : > { %478 = vmatpush.msra.mxu1 %v346_v8  ;;  %1033 = vmatmul.msk.f32.vlgmr.msra.gmra.mxu0 %vm397_vm0, %v337_v9  ;;  %v603_v24 = vld [vmem:[%s1512_s3 + $0x18] sm:$0xff]  ;;  %v604_v26 = vld [vmem:[%s1512_s3 + $0x20] sm:$0xff]  ;;  %v342_v28 = vld [vmem:[%s1510_s1 + $0x28] sm:$0xff] }
  0x14   : > { %1041 = vmatmul.msk.f32.vlgmr.msra.gmra.mxu1 %vm397_vm0, %v337_v9  ;;  %v605_v29 = vld [vmem:[%s1512_s3 + $0x28] sm:$0xff]  ;;  %v343_v30 = vld [vmem:[%s1510_s1 + $0x30] sm:$0xff]  ;;  %v344_v32 = vld [vmem:[%s1510_s1 + $0x38] sm:$0xf] }
  0x15   : > { %v606_v31 = vld [vmem:[%s1512_s3 + $0x30] sm:$0xff]  ;;  %v607_v33 = vld [vmem:[%s1512_s3 + $0x38] sm:$0xf] }
  0x16   : > { %374 = vperm.xlu1 %1100, %v1285_v10   ;;  %364 = vperm.xlu0 %1099, %v350_v11   ;;  %v611_v14 = vld.sshfl [vmem:[#allocation1] sm:$0xff pattern:$0x75316420]  ;;  %v612_v15 = vld.sshfl [vmem:[#allocation1 + $0x8] sm:$0xff pattern:$0x75316420] }
  0x17   : > { %1049 = vmatpush.msk.msra.mxu2 %vm638_vm1, %v611_v14  ;;  %1058 = vmatpush.msk.msra.mxu3 %vm638_vm1, %v612_v15 }
  0x18   : > { %1050 = vmatmul.msk.f32.vlgmr.msra.gmra.mxu2 %vm613_vm2, %v600_v12  ;;  %1059 = vmatmul.msk.f32.vlgmr.msra.gmra.mxu3 %vm613_vm2, %v600_v12 }
  0x19   : > { %384 = vperm.xlu2 %1101, %v1298_v13  }
  0x1b   : > { %1034 = vmatmul.msk.f32.gmra.mxu0 %vm397_vm0, %v338_v16 }
  0x1c   : > { %1042 = vmatmul.msk.f32.gmra.mxu1 %vm397_vm0, %v338_v16 }
  0x1e   : > { %394 = vperm.xlu1 %1100, %v1310_v17   ;;  %389 = vperm.xlu0 %1099, %v355_v18  }
  0x20   : > { %1051 = vmatmul.msk.f32.gmra.mxu2 %vm613_vm2, %v601_v19  ;;  %1060 = vmatmul.msk.f32.gmra.mxu3 %vm613_vm2, %v601_v19 }
  0x21   : > { %1102 = vset.pattern.permute.xlu2 %v1197_v20 }
  0x22   : > { %726 = vperm.xlu2 %1102, %v1260_v1  }
  0x23   : > { %1035 = vmatmul.msk.f32.gmra.mxu0 %vm397_vm0, %v339_v21 }
  0x24   : > { %1043 = vmatmul.msk.f32.gmra.mxu1 %vm397_vm0, %v339_v21 }
  0x26   : > { %1104 = vset.pattern.permute.xlu1 %v1197_v20  ;;  %1103 = vset.pattern.permute.xlu0 %v1197_v20 }
  0x27   : > { %734 = vperm.xlu1 %1104, %v1255_v0   ;;  %730 = vperm.xlu0 %1103, %v350_v11  }
  0x28   : > { %1052 = vmatmul.msk.f32.gmra.mxu2 %vm613_vm2, %v602_v22  ;;  %1061 = vmatmul.msk.f32.gmra.mxu3 %vm613_vm2, %v602_v22 }
  0x2a   : > { %738 = vperm.xlu2 %1102, %v1285_v10  }
  0x2b   : > { %1036 = vmatmul.msk.f32.gmra.mxu0 %vm397_vm0, %v340_v23 }
  0x2c   : > { %1044 = vmatmul.msk.f32.gmra.mxu1 %vm397_vm0, %v340_v23 }
  0x2f   : > { %742 = vperm.xlu1 %1104, %v1269_v3   ;;  %750 = vperm.xlu0 %1103, %v355_v18  }
  0x30   : > { %1053 = vmatmul.msk.f32.gmra.mxu2 %vm613_vm2, %v603_v24  ;;  %1062 = vmatmul.msk.f32.gmra.mxu3 %vm613_vm2, %v603_v24 }
  0x32   : > { %746 = vperm.xlu2 %1102, %v1298_v13  }
  0x33   : > { %1037 = vmatmul.msk.f32.gmra.mxu0 %vm397_vm0, %v341_v25 }
  0x34   : > { %1045 = vmatmul.msk.f32.gmra.mxu1 %vm397_vm0, %v341_v25 }
  0x37   : > { %754 = vperm.xlu1 %1104, %v1310_v17   ;;  %1106 = vset.pattern.permute.xlu0 %v1198_v27 }
  0x38   : > { %778 = vperm.xlu0 %1106, %v350_v11   ;;  %1054 = vmatmul.msk.f32.gmra.mxu2 %vm613_vm2, %v604_v26 }
  0x39   : > { %1063 = vmatmul.msk.f32.gmra.mxu3 %vm613_vm2, %v604_v26 }
  0x3a   : > { %1105 = vset.pattern.permute.xlu2 %v1198_v27 }
  0x3b   : > { %774 = vperm.xlu2 %1105, %v1260_v1   ;;  %1038 = vmatmul.msk.f32.gmra.mxu0 %vm397_vm0, %v342_v28 }
  0x3c   : > { %1046 = vmatmul.msk.f32.gmra.mxu1 %vm397_vm0, %v342_v28 }
  0x3f   : > { %1107 = vset.pattern.permute.xlu1 %v1198_v27 }
  0x40   : > { %782 = vperm.xlu1 %1107, %v1255_v0   ;;  %1055 = vmatmul.msk.f32.gmra.mxu2 %vm613_vm2, %v605_v29 }
  0x41   : > { %1064 = vmatmul.msk.f32.gmra.mxu3 %vm613_vm2, %v605_v29  ;;  %798 = vperm.xlu0 %1106, %v355_v18  }
  0x43   : > { %786 = vperm.xlu2 %1105, %v1285_v10   ;;  %1039 = vmatmul.msk.f32.gmra.mxu0 %vm397_vm0, %v343_v30 }
  0x44   : > { %1047 = vmatmul.msk.f32.gmra.mxu1 %vm397_vm0, %v343_v30 }
  0x48   : > { %790 = vperm.xlu1 %1107, %v1269_v3   ;;  %1056 = vmatmul.msk.f32.gmra.mxu2 %vm613_vm2, %v606_v31 }
  0x49   : > { %1065 = vmatmul.msk.f32.gmra.mxu3 %vm613_vm2, %v606_v31 }
  0x4b   : > { %794 = vperm.xlu2 %1105, %v1298_v13   ;;  %1040 = vmatmul.msk.f32.gmra.mxu0 %vm397_vm0, %v344_v32 }
  0x4c   : > { %1048 = vmatmul.msk.f32.gmra.mxu1 %vm397_vm0, %v344_v32 }
  0x50   : > { %802 = vperm.xlu1 %1107, %v1310_v17   ;;  %1057 = vmatmul.msk.f32.gmra.mxu2 %vm613_vm2, %v607_v33 }
  0x51   : > { %1066 = vmatmul.msk.f32.gmra.mxu3 %vm613_vm2, %v607_v33 }
  0x6a   : > { %v1395_v34 = vpop.permute.xlu2 %379 }
  0x73   : > { %v1397_v37 = vpop.permute.xlu2 %384 }
  0x7c   : > { %v1401_v40 = vpop.permute.xlu2 %726 }
  0x80   : > { %v370_v35 = vpop.permute.xlu1 %369  ;;  %v360_v36 = vpop.permute.xlu0 %359 }
  0x84   : > { %v1415_v47 = vpop.permute.xlu2 %738 }
  0x88   : > { %v1399_v38 = vpop.permute.xlu1 %374  ;;  %v365_v39 = vpop.permute.xlu0 %364 }
  0x8c   : > { %v1425_v61 = vpop.permute.xlu2 %746 }
  0x90   : > { %v1404_v41 = vpop.permute.xlu1 %394  ;;  %v1406_v42 = vpop.permute.xlu0 %389 }
  0x91   : > { %v439_v43 = vpop.f32.mrf.mxu0  ;;  %v480_v44 = vpop.f32.mrf.mxu1 }
  0x92   : > { %v440_v45 = vadd.f32 %v439_v43, %v360_v36  ;;  %v481_v46 = vadd.f32 %v480_v44, %v360_v36 }
  0x94   : > { %504 = vst [vmem:[%s1413_s18] sm:$0xff] %v440_v45  ;;  %v520_v48 = vsub.f32 0.0, %v440_v45  ;;  %v521_v49 = vsub.f32 0.0, %v481_v46 }
  0x95   : > { %505 = vst [vmem:[%s1413_s18 + $0x8] sm:$0xff] %v481_v46  ;;  %v775_v19 = vpop.permute.xlu2 %774 }
  0x96   : > { %v536_v50 = vmul.f32 1.442695, %v520_v48  ;;  %v538_v51 = vmul.f32 1.442695, %v521_v49 }
  0x98   : > { %1108 = vpow2.f32 %v536_v50 }
  0x99   : > { %v1419_v52 = vpop.permute.xlu1 %734  ;;  %1110 = vpow2.f32 %v538_v51  ;;  %v442_v53 = vpop.f32.mrf.mxu0 }
  0x9a   : > { %v483_v54 = vpop.f32.mrf.mxu1  ;;  %v443_v55 = vadd.f32 %v442_v53, %v365_v39  ;;  %v1421_v57 = vpop.permute.xlu0 %730 }
  0x9b   : > { %v484_v56 = vadd.f32 %v483_v54, %v365_v39  ;;  %v660_v60 = vpop.f32.mrf.mxu2  ;;  %v701_v0 = vpop.f32.mrf.mxu3 }
  0x9c   : > { %506 = vst [vmem:[%s1413_s18 + $0x10] sm:$0xff] %v443_v55  ;;  %v522_v58 = vsub.f32 0.0, %v443_v55 }
  0x9d   : > { %v523_v59 = vsub.f32 0.0, %v484_v56  ;;  %507 = vst [vmem:[%s1413_s18 + $0x18] sm:$0xff] %v484_v56 }
  0x9e   : > { %v1109_v62 = vpop.eup %1108  ;;  %v540_v63 = vmul.f32 1.442695, %v522_v58 }
  0x9f   : > { %v1111_v1 = vpop.eup %1110  ;;  %v568_v2 = vadd.f32 1.0, %v1109_v62  ;;  %v542_v3 = vmul.f32 1.442695, %v523_v59 }
  0xa0   : > { %v569_v4 = vadd.f32 1.0, %v1111_v1  ;;  %1112 = vpow2.f32 %v540_v63 }
  0xa1   : > { %1114 = vrcp.f32 %v568_v2  ;;  %v445_v5 = vpop.f32.mrf.mxu0  ;;  %v1427_v9 = vpop.permute.xlu1 %742 }
  0xa2   : > { %v486_v6 = vpop.f32.mrf.mxu1  ;;  %1116 = vrcp.f32 %v569_v4  ;;  %v446_v7 = vadd.f32 %v445_v5, %v370_v35  ;;  %v1431_v12 = vpop.permute.xlu0 %750 }
  0xa3   : > { %v487_v8 = vadd.f32 %v486_v6, %v370_v35  ;;  %1118 = vpow2.f32 %v542_v3  ;;  %v1433_v16 = vpop.f32.mrf.mxu2  ;;  %v1436_v22 = vpop.f32.mrf.mxu3 }
  0xa4   : > { %508 = vst [vmem:[%s1413_s18 + $0x20] sm:$0xff] %v446_v7  ;;  %v524_v10 = vsub.f32 0.0, %v446_v7 }
  0xa5   : > { %v525_v11 = vsub.f32 0.0, %v487_v8  ;;  %509 = vst [vmem:[%s1413_s18 + $0x28] sm:$0xff] %v487_v8 }
  0xa6   : > { %v1113_v13 = vpop.eup %1112  ;;  %v544_v14 = vmul.f32 1.442695, %v524_v10 }
  0xa7   : > { %v546_v15 = vmul.f32 1.442695, %v525_v11  ;;  %v1115_v17 = vpop.eup %1114  ;;  %v570_v18 = vadd.f32 1.0, %v1113_v13 }
  0xa8   : > { %v1117_v20 = vpop.eup %1116  ;;  %1120 = vpow2.f32 %v544_v14  ;;  %v757_v21 = vmul.f32 %v1115_v17, %v1401_v40 }
  0xa9   : > { %v1119_v23 = vpop.eup %1118  ;;  %1122 = vrcp.f32 %v570_v18  ;;  %v758_v24 = vmul.f32 %v1117_v20, %v1401_v40  ;;  %v448_v25 = vpop.f32.mrf.mxu0 }
  0xaa   : > { %v489_v26 = vpop.f32.mrf.mxu1  ;;  %v571_v27 = vadd.f32 1.0, %v1119_v23  ;;  %1124 = vpow2.f32 %v546_v15  ;;  %v805_v28 = vadd.f32 %v775_v19, %v757_v21  ;;  %v449_v29 = vadd.f32 %v448_v25, %v1399_v38  ;;  %v1450_v39 = vpop.permute.xlu1 %754 }
  0xab   : > { %v806_v30 = vadd.f32 %v775_v19, %v758_v24  ;;  %v490_v31 = vadd.f32 %v489_v26, %v1399_v38  ;;  %v779_v49 = vpop.permute.xlu0 %778  ;;  %v666_v53 = vpop.f32.mrf.mxu2 }
  0xac   : > { %1126 = vrcp.f32 %v571_v27  ;;  %510 = vst [vmem:[%s1413_s18 + $0x30] sm:$0xff] %v449_v29  ;;  %v526_v32 = vsub.f32 0.0, %v449_v29  ;;  %v821_v33 = vmul.f32 %v1115_v17, %v805_v28 }
  0xad   : > { %511 = vst [vmem:[%s1413_s18 + $0x38] sm:$0xff] %v490_v31  ;;  %v527_v35 = vsub.f32 0.0, %v490_v31  ;;  %v822_v36 = vmul.f32 %v1117_v20, %v806_v30 }
  0xae   : > { %v1121_v40 = vpop.eup %1120  ;;  %v548_v43 = vmul.f32 1.442695, %v526_v32  ;;  %v837_v38 = vadd.f32 %v821_v33, %v660_v60 }
  0xaf   : > { %v1123_v44 = vpop.eup %1122  ;;  %v572_v45 = vadd.f32 1.0, %v1121_v40  ;;  %v550_v46 = vmul.f32 1.442695, %v527_v35  ;;  %v838_v48 = vadd.f32 %v822_v36, %v701_v0  ;;  %v707_v0 = vpop.f32.mrf.mxu3 }
  0xb0   : > { %v1125_v50 = vpop.eup %1124  ;;  %v759_v51 = vmul.f32 %v1123_v44, %v1421_v57  ;;  %1128 = vpow2.f32 %v548_v43  ;;  %853 = vst [vmem:[%s1448_s25] sm:$0xff] %v837_v38  ;;  %v787_v40 = vpop.permute.xlu2 %786 }
  0xb1   : > { %1130 = vrcp.f32 %v572_v45  ;;  %v573_v54 = vadd.f32 1.0, %v1125_v50  ;;  %854 = vst [vmem:[%s1448_s25 + $0x8] sm:$0xff] %v838_v48  ;;  %v451_v55 = vpop.f32.mrf.mxu0 }
  0xb2   : > { %v492_v56 = vpop.f32.mrf.mxu1  ;;  %v1127_v58 = vpop.eup %1126  ;;  %1132 = vpow2.f32 %v550_v46  ;;  %v807_v59 = vadd.f32 %v779_v49, %v759_v51  ;;  %v452_v60 = vadd.f32 %v451_v55, %v1395_v34 }
  0xb3   : > { %v493_v62 = vadd.f32 %v492_v56, %v1395_v34  ;;  %v760_v63 = vmul.f32 %v1127_v58, %v1421_v57  ;;  %1134 = vrcp.f32 %v573_v54  ;;  %v783_v34 = vpop.permute.xlu1 %782  ;;  %v669_v25 = vpop.f32.mrf.mxu2 }
  0xb4   : > { %512 = vst [vmem:[%s1413_s18 + $0x40] sm:$0xff] %v452_v60  ;;  %v528_v1 = vsub.f32 0.0, %v452_v60  ;;  %v823_v3 = vmul.f32 %v1123_v44, %v807_v59 }
  0xb5   : > { %v529_v2 = vsub.f32 0.0, %v493_v62  ;;  %v808_v4 = vadd.f32 %v779_v49, %v760_v63  ;;  %513 = vst [vmem:[%s1413_s18 + $0x48] sm:$0xff] %v493_v62 }
  0xb6   : > { %v1129_v5 = vpop.eup %1128  ;;  %v552_v6 = vmul.f32 1.442695, %v528_v1  ;;  %v839_v8 = vadd.f32 %v823_v3, %v1433_v16 }
  0xb7   : > { %v554_v7 = vmul.f32 1.442695, %v529_v2  ;;  %v1131_v10 = vpop.eup %1130  ;;  %v574_v11 = vadd.f32 1.0, %v1129_v5  ;;  %v824_v13 = vmul.f32 %v1127_v58, %v808_v4  ;;  %v710_v29 = vpop.f32.mrf.mxu3 }
  0xb8   : > { %v1133_v57 = vpop.eup %1132  ;;  %1136 = vpow2.f32 %v552_v6  ;;  %855 = vst [vmem:[%s1448_s25 + $0x10] sm:$0xff] %v839_v8  ;;  %v761_v14 = vmul.f32 %v1131_v10, %v1419_v52 }
  0xb9   : > { %v1135_v15 = vpop.eup %1134  ;;  %1138 = vrcp.f32 %v574_v11  ;;  %v575_v17 = vadd.f32 1.0, %v1133_v57  ;;  %v840_v18 = vadd.f32 %v824_v13, %v1436_v22  ;;  %v454_v19 = vpop.f32.mrf.mxu0 }
  0xba   : > { %v495_v20 = vpop.f32.mrf.mxu1  ;;  %1140 = vpow2.f32 %v554_v7  ;;  %v762_v16 = vmul.f32 %v1135_v15, %v1419_v52  ;;  %v809_v21 = vadd.f32 %v783_v34, %v761_v14  ;;  %v455_v23 = vadd.f32 %v454_v19, %v1397_v37 }
  0xbb   : > { %1142 = vrcp.f32 %v575_v17  ;;  %856 = vst [vmem:[%s1448_s25 + $0x18] sm:$0xff] %v840_v18  ;;  %v496_v24 = vadd.f32 %v495_v20, %v1397_v37  ;;  %v672_v59 = vpop.f32.mrf.mxu2  ;;  %v791_v3 = vpop.permute.xlu1 %790 }
  0xbc   : > { %v810_v26 = vadd.f32 %v783_v34, %v762_v16  ;;  %514 = vst [vmem:[%s1413_s18 + $0x50] sm:$0xff] %v455_v23  ;;  %v530_v27 = vsub.f32 0.0, %v455_v23  ;;  %v825_v28 = vmul.f32 %v1131_v10, %v809_v21 }
  0xbd   : > { %515 = vst [vmem:[%s1413_s18 + $0x58] sm:$0xff] %v496_v24  ;;  %v531_v22 = vsub.f32 0.0, %v496_v24 }
  0xbe   : > { %v1137_v30 = vpop.eup %1136  ;;  %v556_v31 = vmul.f32 1.442695, %v530_v27  ;;  %v841_v32 = vadd.f32 %v825_v28, %v666_v53  ;;  %v826_v52 = vmul.f32 %v1135_v15, %v810_v26  ;;  %v795_v26 = vpop.permute.xlu2 %794 }
  0xbf   : > { %v1139_v33 = vpop.eup %1138  ;;  %v576_v35 = vadd.f32 1.0, %v1137_v30  ;;  %v558_v36 = vmul.f32 1.442695, %v531_v22  ;;  %v713_v4 = vpop.f32.mrf.mxu3 }
  0xc0   : > { %v1141_v43 = vpop.eup %1140  ;;  %1144 = vpow2.f32 %v556_v31  ;;  %857 = vst [vmem:[%s1448_s25 + $0x20] sm:$0xff] %v841_v32  ;;  %v842_v37 = vadd.f32 %v826_v52, %v707_v0  ;;  %v763_v38 = vmul.f32 %v1139_v33, %v1415_v47 }
  0xc1   : > { %v1143_v44 = vpop.eup %1142  ;;  %1146 = vrcp.f32 %v576_v35  ;;  %v577_v45 = vadd.f32 1.0, %v1141_v43  ;;  %v457_v46 = vpop.f32.mrf.mxu0 }
  0xc2   : > { %v498_v48 = vpop.f32.mrf.mxu1  ;;  %1148 = vpow2.f32 %v558_v36  ;;  %858 = vst [vmem:[%s1448_s25 + $0x28] sm:$0xff] %v842_v37  ;;  %v764_v49 = vmul.f32 %v1143_v44, %v1415_v47  ;;  %v811_v50 = vadd.f32 %v787_v40, %v763_v38  ;;  %v458_v51 = vadd.f32 %v457_v46, %v1406_v42 }
  0xc3   : > { %1150 = vrcp.f32 %v577_v45  ;;  %v499_v53 = vadd.f32 %v498_v48, %v1406_v42  ;;  %v675_v27 = vpop.f32.mrf.mxu2 }
  0xc4   : > { %v812_v54 = vadd.f32 %v787_v40, %v764_v49  ;;  %516 = vst [vmem:[%s1413_s18 + $0x60] sm:$0xff] %v458_v51  ;;  %v532_v55 = vsub.f32 0.0, %v458_v51  ;;  %v827_v56 = vmul.f32 %v1139_v33, %v811_v50 }
  0xc5   : > { %517 = vst [vmem:[%s1413_s18 + $0x68] sm:$0xff] %v499_v53  ;;  %v533_v58 = vsub.f32 0.0, %v499_v53 }
  0xc6   : > { %v1145_v60 = vpop.eup %1144  ;;  %v560_v62 = vmul.f32 1.442695, %v532_v55  ;;  %v843_v63 = vadd.f32 %v827_v56, %v669_v25  ;;  %v828_v0 = vmul.f32 %v1143_v44, %v812_v54  ;;  %v799_v44 = vpop.permute.xlu0 %798 }
  0xc7   : > { %v1147_v1 = vpop.eup %1146  ;;  %v578_v47 = vadd.f32 1.0, %v1145_v60  ;;  %v562_v2 = vmul.f32 1.442695, %v533_v58  ;;  %v716_v31 = vpop.f32.mrf.mxu3 }
  0xc8   : > { %v1149_v5 = vpop.eup %1148  ;;  %1152 = vpow2.f32 %v560_v62  ;;  %859 = vst [vmem:[%s1448_s25 + $0x30] sm:$0xff] %v843_v63  ;;  %v844_v42 = vadd.f32 %v828_v0, %v710_v29  ;;  %v765_v6 = vmul.f32 %v1147_v1, %v1427_v9 }
  0xc9   : > { %v1151_v7 = vpop.eup %1150  ;;  %1154 = vrcp.f32 %v578_v47  ;;  %v579_v8 = vadd.f32 1.0, %v1149_v5  ;;  %v460_v10 = vpop.f32.mrf.mxu0 }
  0xca   : > { %v501_v11 = vpop.f32.mrf.mxu1  ;;  %1156 = vpow2.f32 %v562_v2  ;;  %860 = vst [vmem:[%s1448_s25 + $0x38] sm:$0xff] %v844_v42  ;;  %v766_v13 = vmul.f32 %v1151_v7, %v1427_v9  ;;  %v813_v34 = vadd.f32 %v791_v3, %v765_v6  ;;  %v461_v57 = vadd.f32 %v460_v10, %v1404_v41 }
  0xcb   : > { %1158 = vrcp.f32 %v579_v8  ;;  %v502_v14 = vadd.f32 %v501_v11, %v1404_v41  ;;  %v678_v50 = vpop.f32.mrf.mxu2 }
  0xcc   : > { %v814_v15 = vadd.f32 %v791_v3, %v766_v13  ;;  %518 = vst [vmem:[%s1413_s18 + $0x70] sm:$0xf] %v461_v57  ;;  %v534_v17 = vsub.f32 0.0, %v461_v57  ;;  %v829_v18 = vmul.f32 %v1147_v1, %v813_v34  ;;  %v803_v1 = vpop.permute.xlu1 %802 }
  0xcd   : > { %519 = vst [vmem:[%s1413_s18 + $0x78] sm:$0xf] %v502_v14  ;;  %v535_v19 = vsub.f32 0.0, %v502_v14 }
  0xce   : > { %v1153_v20 = vpop.eup %1152  ;;  %v564_v16 = vmul.f32 1.442695, %v534_v17  ;;  %v845_v21 = vadd.f32 %v829_v18, %v672_v59  ;;  %v830_v23 = vmul.f32 %v1151_v7, %v814_v15 }
  0xcf   : > { %v1155_v24 = vpop.eup %1154  ;;  %v580_v9 = vadd.f32 1.0, %v1153_v20  ;;  %v566_v25 = vmul.f32 1.442695, %v535_v19  ;;  %v719_v54 = vpop.f32.mrf.mxu3 }
  0xd0   : > { %v1157_v28 = vpop.eup %1156  ;;  %1160 = vpow2.f32 %v564_v16  ;;  %861 = vst [vmem:[%s1448_s25 + $0x40] sm:$0xff] %v845_v21  ;;  %v846_v41 = vadd.f32 %v830_v23, %v713_v4  ;;  %v767_v22 = vmul.f32 %v1155_v24, %v1425_v61 }
  0xd1   : > { %v1159_v29 = vpop.eup %1158  ;;  %1162 = vrcp.f32 %v580_v9  ;;  %v581_v30 = vadd.f32 1.0, %v1157_v28 }
  0xd2   : > { %1164 = vpow2.f32 %v566_v25  ;;  %862 = vst [vmem:[%s1448_s25 + $0x48] sm:$0xff] %v846_v41  ;;  %v768_v32 = vmul.f32 %v1159_v29, %v1425_v61  ;;  %v815_v52 = vadd.f32 %v795_v26, %v767_v22 }
  0xd3   : > { %1166 = vrcp.f32 %v581_v30  ;;  %v681_v2 = vpop.f32.mrf.mxu2 }
  0xd4   : > { %v816_v33 = vadd.f32 %v795_v26, %v768_v32  ;;  %v831_v35 = vmul.f32 %v1155_v24, %v815_v52 }
  0xd6   : > { %v1161_v36 = vpop.eup %1160  ;;  %v847_v40 = vadd.f32 %v831_v35, %v675_v27  ;;  %v832_v43 = vmul.f32 %v1159_v29, %v816_v33 }
  0xd7   : > { %v1163_v37 = vpop.eup %1162  ;;  %v582_v38 = vadd.f32 1.0, %v1161_v36  ;;  %v722_v5 = vpop.f32.mrf.mxu3 }
  0xd8   : > { %v1165_v45 = vpop.eup %1164  ;;  %863 = vst [vmem:[%s1448_s25 + $0x50] sm:$0xff] %v847_v40  ;;  %v848_v46 = vadd.f32 %v832_v43, %v716_v31  ;;  %v769_v48 = vmul.f32 %v1163_v37, %v1431_v12 }
  0xd9   : > { %v1167_v49 = vpop.eup %1166  ;;  %1168 = vrcp.f32 %v582_v38  ;;  %v583_v61 = vadd.f32 1.0, %v1165_v45 }
  0xda   : > { %864 = vst [vmem:[%s1448_s25 + $0x58] sm:$0xff] %v848_v46  ;;  %v770_v51 = vmul.f32 %v1167_v49, %v1431_v12  ;;  %v817_v53 = vadd.f32 %v799_v44, %v769_v48 }
  0xdb   : > { %1170 = vrcp.f32 %v583_v61 }
  0xdc   : > { %v818_v55 = vadd.f32 %v799_v44, %v770_v51  ;;  %v833_v56 = vmul.f32 %v1163_v37, %v817_v53 }
  0xde   : > { %v849_v58 = vadd.f32 %v833_v56, %v678_v50  ;;  %v834_v59 = vmul.f32 %v1167_v49, %v818_v55 }
  0xdf   : > { %v1169_v60 = vpop.eup %1168 }
  0xe0   : > { %v771_v62 = vmul.f32 %v1169_v60, %v1450_v39  ;;  %865 = vst [vmem:[%s1448_s25 + $0x60] sm:$0xff] %v849_v58  ;;  %v850_v63 = vadd.f32 %v834_v59, %v719_v54 }
  0xe1   : > { %v1171_v0 = vpop.eup %1170 }
  0xe2   : > { %v772_v47 = vmul.f32 %v1171_v0, %v1450_v39  ;;  %v819_v12 = vadd.f32 %v803_v1, %v771_v62  ;;  %866 = vst [vmem:[%s1448_s25 + $0x68] sm:$0xff] %v850_v63 }
  0xe4   : > { %v820_v3 = vadd.f32 %v803_v1, %v772_v47  ;;  %v835_v4 = vmul.f32 %v1169_v60, %v819_v12 }
  0xe6   : > { %v851_v42 = vadd.f32 %v835_v4, %v681_v2  ;;  %v836_v6 = vmul.f32 %v1171_v0, %v820_v3 }
  0xe8   : > { %867 = vst [vmem:[%s1448_s25 + $0x70] sm:$0xf] %v851_v42  ;;  %v852_v7 = vadd.f32 %v836_v6, %v722_v5 }
  0xea   : > { %868 = vst [vmem:[%s1448_s25 + $0x78] sm:$0xf] %v852_v7 }
  0xeb PF: > { %s17_s23 = sadd.s32 1, %s1194_s23   ;;  %s1516_s21 = smov %s1190_s22 }
  0xec   : > { %p14_p5 = scmp.ge.s32.totalorder %s17_s23, 4   ;;  %s1517_s22 = smov %s1519_s24 }
  0xee   :  { %16 = sbr.rel (!%p14_p5) target bundleno = 2 (0x2), region = 85 }

</bundles_post_ra>
